<compile_context>
chip_gen: v7x
topology: tpu7x:2x2x1
jax: 0.10.0
libtpu: 0.0.40
codegen_flags: <defaults>
</compile_context>

<pallas_src>
import functools

import jax
import jax.numpy as jnp
from jax.experimental import pallas as pl
from jax.experimental.pallas import tpu as pltpu

HIDDEN = 32
NUM_CLASSES = 2
BN_EPS = 1e-5
LANE = 128

# ---- packed-parameter row layout (weight blocks start on 8-row boundaries;
#      the single-row vectors all live inside sublane tile 0) ----------------
ROW_B1, ROW_G1, ROW_BE1 = 0, 1, 2
ROW_B2, ROW_G2, ROW_BE2 = 3, 4, 5
ROW_BC = 6
ROW_W1 = 8                       # (3, HIDDEN)
ROW_W2 = 16                      # (HIDDEN, 2*HIDDEN)
ROW_WC = ROW_W2 + HIDDEN         # (2*HIDDEN, NUM_CLASSES)
P_ROWS = ROW_WC + 2 * HIDDEN     # 112
P_COLS = LANE


def _round_up(x, m):
    return (x + m - 1) // m * m


def _gcn_net_kernel(d_ref, p_ref, out_ref, *, n, na, num_graphs, mxu_dtype):
    f32 = jnp.float32

    # ---- unpack per-batch data (every slice starts on a 128-lane tile) -----
    a = d_ref[:, 0:n].astype(mxu_dtype)                     # (N, N)   A_hat
    x = d_ref[:, na:na + 3].astype(mxu_dtype)               # (N, 3)   pos
    mask_t = d_ref[:, na + LANE:na + LANE + num_graphs]     # (N, G)   0/1 f32

    # ---- unpack parameters (static slices of the packed buffer) ------------
    b1 = p_ref[ROW_B1:ROW_B1 + 1, 0:HIDDEN]
    g1 = p_ref[ROW_G1:ROW_G1 + 1, 0:HIDDEN]
    be1 = p_ref[ROW_BE1:ROW_BE1 + 1, 0:HIDDEN]
    b2 = p_ref[ROW_B2:ROW_B2 + 1, 0:2 * HIDDEN]
    g2 = p_ref[ROW_G2:ROW_G2 + 1, 0:2 * HIDDEN]
    be2 = p_ref[ROW_BE2:ROW_BE2 + 1, 0:2 * HIDDEN]
    bc = p_ref[ROW_BC:ROW_BC + 1, 0:NUM_CLASSES]
    w1 = p_ref[ROW_W1:ROW_W1 + 3, 0:HIDDEN].astype(mxu_dtype)
    w2 = p_ref[ROW_W2:ROW_W2 + HIDDEN, 0:2 * HIDDEN].astype(mxu_dtype)
    wc = p_ref[ROW_WC:ROW_WC + 2 * HIDDEN, 0:NUM_CLASSES].astype(mxu_dtype)

    # ---- BatchNorm1d (training mode, biased var, one-pass stats) + ReLU ----
    def bn_relu(h, g, b):
        m = jnp.mean(h, axis=0, keepdims=True)
        v = jnp.mean(h * h, axis=0, keepdims=True) - m * m
        return jnp.maximum((h - m) * jax.lax.rsqrt(v + BN_EPS) * g + b, 0.0)

    # ---- GCN layer 1: aggregate (A_hat @ X) then linear ---------------------
    agg1 = jnp.dot(a, x, preferred_element_type=f32)                   # (N, 3)
    h1 = jnp.dot(agg1.astype(mxu_dtype), w1,
                 preferred_element_type=f32) + b1                      # (N, H)
    h1 = bn_relu(h1, g1, be1)

    # ---- GCN layer 2 ---------------------------------------------------------
    agg2 = jnp.dot(a, h1.astype(mxu_dtype), preferred_element_type=f32)
    h2 = jnp.dot(agg2.astype(mxu_dtype), w2,
                 preferred_element_type=f32) + b2                      # (N, 2H)
    h2 = bn_relu(h2, g2, be2)

    # ---- global_max_pool: masked max over the leading (node) axis -----------
    # mask_t is (N, G) with 0/1 entries; h2 >= 0 after ReLU so multiply-mask
    # is exact (masked-out rows contribute 0 <= max over member rows).
    pooled = jnp.max(mask_t[:, :, None] * h2[:, None, :], axis=0)      # (G, 2H)

    # ---- classifier ----------------------------------------------------------
    logits = jnp.dot(pooled.astype(mxu_dtype), wc,
                     preferred_element_type=f32) + bc
    out_ref[...] = logits                                              # (G, C)


def gcn_net_pallas(data, packed_params, *, num_nodes, num_graphs,
                   mxu_dtype=jnp.float32):
    """mxu_dtype=jnp.bfloat16 is recommended on v6e/v7x; keep f32 on v5e."""
    vmem = pl.BlockSpec(memory_space=pltpu.MemorySpace.VMEM)
    na = _round_up(num_nodes, LANE)
    kernel = functools.partial(_gcn_net_kernel, n=num_nodes, na=na,
                               num_graphs=num_graphs, mxu_dtype=mxu_dtype)

    n, h = num_nodes, HIDDEN
    flops = (2 * n * n * (3 + h)                       # two A_hat @ H aggregations
             + 2 * n * (3 * h + h * 2 * h)             # two linear layers
             + 2 * num_graphs * (2 * h) * NUM_CLASSES  # classifier
             + 12 * n * 3 * h)                         # BN / ReLU / pool (rough)
    bytes_accessed = 4 * (int(data.size) + int(packed_params.size)
                          + num_graphs * NUM_CLASSES)
    cost = pl.CostEstimate(flops=int(flops), transcendentals=3 * h,
                           bytes_accessed=int(bytes_accessed))

    return pl.pallas_call(
        kernel,
        out_shape=jax.ShapeDtypeStruct((num_graphs, NUM_CLASSES), jnp.float32),
        in_specs=[vmem, vmem],
        out_specs=vmem,
        cost_estimate=cost,
    )(data, packed_params)


# ------------------------- plain-JAX glue ------------------------------------
def build_norm_adj(edge_index, num_nodes):
    """Dense A_hat matching the spec: add_self_loops + degree(row)^-1/2 norm."""
    row, col = edge_index[0], edge_index[1]
    loop = jnp.arange(num_nodes, dtype=edge_index.dtype)
    row = jnp.concatenate([row, loop])
    col = jnp.concatenate([col, loop])
    deg = jnp.zeros((num_nodes,), jnp.float32).at[row].add(1.0)
    dis = jnp.where(deg > 0, jax.lax.rsqrt(deg), 0.0)
    norm = dis[row] * dis[col]
    # aggr_out[i] = sum_{edge j->i} norm_e * h[j]  =>  A_hat[i, j] += norm
    a_hat = jnp.zeros((num_nodes, num_nodes), jnp.float32).at[col, row].add(norm)
    return a_hat


def pack_data(a_hat, pos, batch, num_graphs):
    """Pack A_hat, pos and the node->graph mask into one lane-aligned slab."""
    n = int(a_hat.shape[0])
    na = _round_up(n, LANE)
    mask_t = (batch[:, None] == jnp.arange(num_graphs)[None, :]).astype(jnp.float32)
    data = jnp.zeros((n, na + 2 * LANE), jnp.float32)
    data = data.at[:, 0:n].set(a_hat)
    data = data.at[:, na:na + 3].set(pos)
    data = data.at[:, na + LANE:na + LANE + num_graphs].set(mask_t)
    return data


def init_params(key):
    ks = jax.random.split(key, 3)

    def lin(k, fan_in, fan_out):
        bound = 1.0 / jnp.sqrt(jnp.float32(fan_in))
        kw, kb = jax.random.split(k)
        w = jax.random.uniform(kw, (fan_in, fan_out), jnp.float32, -bound, bound)
        b = jax.random.uniform(kb, (1, fan_out), jnp.float32, -bound, bound)
        return w, b

    w1, b1 = lin(ks[0], 3, HIDDEN)
    w2, b2 = lin(ks[1], HIDDEN, 2 * HIDDEN)
    wc, bc = lin(ks[2], 2 * HIDDEN, NUM_CLASSES)
    return dict(
        w1=w1, b1=b1,
        g1=jnp.ones((1, HIDDEN), jnp.float32), be1=jnp.zeros((1, HIDDEN), jnp.float32),
        w2=w2, b2=b2,
        g2=jnp.ones((1, 2 * HIDDEN), jnp.float32), be2=jnp.zeros((1, 2 * HIDDEN), jnp.float32),
        wc=wc, bc=bc,
    )


def pack_params(params):
    """Pack all 10 small parameter arrays into one (P_ROWS, 128) f32 buffer."""
    p = jnp.zeros((P_ROWS, P_COLS), jnp.float32)
    p = p.at[ROW_B1, :HIDDEN].set(params["b1"][0])
    p = p.at[ROW_G1, :HIDDEN].set(params["g1"][0])
    p = p.at[ROW_BE1, :HIDDEN].set(params["be1"][0])
    p = p.at[ROW_B2, :2 * HIDDEN].set(params["b2"][0])
    p = p.at[ROW_G2, :2 * HIDDEN].set(params["g2"][0])
    p = p.at[ROW_BE2, :2 * HIDDEN].set(params["be2"][0])
    p = p.at[ROW_BC, :NUM_CLASSES].set(params["bc"][0])
    p = p.at[ROW_W1:ROW_W1 + 3, :HIDDEN].set(params["w1"])
    p = p.at[ROW_W2:ROW_W2 + HIDDEN, :2 * HIDDEN].set(params["w2"])
    p = p.at[ROW_WC:ROW_WC + 2 * HIDDEN, :NUM_CLASSES].set(params["wc"])
    return p


def reference_forward(a_hat, pos, params, mask_gn, mxu_dtype=jnp.float32):
    """Pure-JAX reference mirroring the kernel's cast placement."""
    f32 = jnp.float32

    def mm(a, b):
        return jnp.dot(a.astype(mxu_dtype), b.astype(mxu_dtype),
                       preferred_element_type=f32)

    def bn_relu(h, g, b):
        m = jnp.mean(h, axis=0, keepdims=True)
        v = jnp.mean(h * h, axis=0, keepdims=True) - m * m
        return jnp.maximum((h - m) * jax.lax.rsqrt(v + BN_EPS) * g + b, 0.0)

    h = mm(mm(a_hat, pos), params["w1"]) + params["b1"]
    h = bn_relu(h, params["g1"], params["be1"])
    h = mm(mm(a_hat, h), params["w2"]) + params["b2"]
    h = bn_relu(h, params["g2"], params["be2"])
    pooled = jnp.max(jnp.where(mask_gn[:, :, None] > 0, h[None], -jnp.inf), axis=1)
    return mm(pooled, params["wc"]) + params["bc"]


if __name__ == "__main__":
    key = jax.random.PRNGKey(0)
    k_pos, k_edge, k_par = jax.random.split(key, 3)

    N = 16            # nodes total
    G = 2             # graphs in the batch (8 nodes each)
    E = 40            # directed edges

    pos = jax.random.normal(k_pos, (N, 3), jnp.float32)
    # random edges kept within each graph's node range
    src = jax.random.randint(k_edge, (E,), 0, N // G)
    dst = jax.random.randint(jax.random.fold_in(k_edge, 1), (E,), 0, N // G)
    graph_of_edge = jnp.repeat(jnp.arange(G), E // G)
    edge_index = jnp.stack([src + graph_of_edge * (N // G),
                            dst + graph_of_edge * (N // G)]).astype(jnp.int32)
    batch = jnp.repeat(jnp.arange(G), N // G)                             # (N,)

    params = init_params(k_par)
    packed = pack_params(params)
    a_hat = build_norm_adj(edge_index, N)
    data = pack_data(a_hat, pos, batch, G)
    mask_gn = (batch[None, :] == jnp.arange(G)[:, None]).astype(jnp.float32)

    # ---- f32 MXU path (default; exact vs f32 reference) ---------------------
    out = gcn_net_pallas(data, packed, num_nodes=N, num_graphs=G)
    out = jax.block_until_ready(out)
    ref = reference_forward(a_hat, pos, params, mask_gn)
    assert out.shape == (G, NUM_CLASSES)
    assert jnp.allclose(out, ref, atol=1e-4, rtol=1e-4), (out, ref)

    # ---- bf16 MXU path (recommended on v6e/v7x); compared against a
    #      reference with identical operand casts ------------------------------
    out_bf = gcn_net_pallas(data, packed, num_nodes=N, num_graphs=G,
                            mxu_dtype=jnp.bfloat16)
    out_bf = jax.block_until_ready(out_bf)
    ref_bf = reference_forward(a_hat, pos, params, mask_gn, mxu_dtype=jnp.bfloat16)
    assert jnp.allclose(out_bf, ref_bf, atol=1e-2, rtol=1e-2), (out_bf, ref_bf)

    print("KERNEL_OK")
</pallas_src>

<mosaic_0001>
module attributes {stable_mosaic.version = 11 : i64} {
  func.func @_gcn_net_kernel(%arg0: memref<16x384xf32, #tpu.memory_space<vmem>>, %arg1: memref<112x128xf32, #tpu.memory_space<vmem>>, %arg2: memref<2x2xf32, #tpu.memory_space<vmem>>) attributes {dimension_semantics = [], scalar_prefetch = 0 : i64, scratch_operands = 0 : i64, tpu.core_type = #tpu.core_type<tc>} {
    %c0 = arith.constant 0 : index
    %c0_0 = arith.constant 0 : index
    %0 = vector.load %arg0[%c0, %c0_0] : memref<16x384xf32, #tpu.memory_space<vmem>>, vector<16x16xf32>
    %c0_1 = arith.constant 0 : index
    %c128 = arith.constant 128 : index
    %1 = vector.load %arg0[%c0_1, %c128] : memref<16x384xf32, #tpu.memory_space<vmem>>, vector<16x3xf32>
    %c0_2 = arith.constant 0 : index
    %c256 = arith.constant 256 : index
    %2 = vector.load %arg0[%c0_2, %c256] : memref<16x384xf32, #tpu.memory_space<vmem>>, vector<16x2xf32>
    %c0_3 = arith.constant 0 : index
    %c0_4 = arith.constant 0 : index
    %3 = vector.load %arg1[%c0_3, %c0_4] : memref<112x128xf32, #tpu.memory_space<vmem>>, vector<1x32xf32>
    %c1 = arith.constant 1 : index
    %c0_5 = arith.constant 0 : index
    %4 = vector.load %arg1[%c1, %c0_5] : memref<112x128xf32, #tpu.memory_space<vmem>>, vector<1x32xf32>
    %c2 = arith.constant 2 : index
    %c0_6 = arith.constant 0 : index
    %5 = vector.load %arg1[%c2, %c0_6] : memref<112x128xf32, #tpu.memory_space<vmem>>, vector<1x32xf32>
    %c3 = arith.constant 3 : index
    %c0_7 = arith.constant 0 : index
    %6 = vector.load %arg1[%c3, %c0_7] : memref<112x128xf32, #tpu.memory_space<vmem>>, vector<1x64xf32>
    %c4 = arith.constant 4 : index
    %c0_8 = arith.constant 0 : index
    %7 = vector.load %arg1[%c4, %c0_8] : memref<112x128xf32, #tpu.memory_space<vmem>>, vector<1x64xf32>
    %c5 = arith.constant 5 : index
    %c0_9 = arith.constant 0 : index
    %8 = vector.load %arg1[%c5, %c0_9] : memref<112x128xf32, #tpu.memory_space<vmem>>, vector<1x64xf32>
    %c6 = arith.constant 6 : index
    %c0_10 = arith.constant 0 : index
    %9 = vector.load %arg1[%c6, %c0_10] : memref<112x128xf32, #tpu.memory_space<vmem>>, vector<1x2xf32>
    %c8 = arith.constant 8 : index
    %c0_11 = arith.constant 0 : index
    %10 = vector.load %arg1[%c8, %c0_11] : memref<112x128xf32, #tpu.memory_space<vmem>>, vector<3x32xf32>
    %c16 = arith.constant 16 : index
    %c0_12 = arith.constant 0 : index
    %11 = vector.load %arg1[%c16, %c0_12] : memref<112x128xf32, #tpu.memory_space<vmem>>, vector<32x64xf32>
    %c48 = arith.constant 48 : index
    %c0_13 = arith.constant 0 : index
    %12 = vector.load %arg1[%c48, %c0_13] : memref<112x128xf32, #tpu.memory_space<vmem>>, vector<64x2xf32>
    %cst = arith.constant dense<0.000000e+00> : vector<16x3xf32>
    %13 = tpu.matmul %0, %1, %cst {dimension_numbers = #tpu.dot_dimension_numbers<[1], [0], [0], [1], [0, 0, 1, 1], [], []>} : vector<16x16xf32>, vector<16x3xf32>, vector<16x3xf32> -> vector<16x3xf32>
    %cst_14 = arith.constant dense<0.000000e+00> : vector<16x32xf32>
    %14 = tpu.matmul %13, %10, %cst_14 {dimension_numbers = #tpu.dot_dimension_numbers<[1], [0], [0], [1], [0, 0, 1, 1], [], []>} : vector<16x3xf32>, vector<3x32xf32>, vector<16x32xf32> -> vector<16x32xf32>
    %15 = vector.broadcast %3 : vector<1x32xf32> to vector<16x32xf32>
    %16 = arith.addf %14, %15 : vector<16x32xf32>
    %cst_15 = arith.constant dense<0.000000e+00> : vector<32xf32>
    %17 = vector.multi_reduction <add>, %16, %cst_15 [0] : vector<16x32xf32> to vector<32xf32>
    %18 = vector.shape_cast %17 : vector<32xf32> to vector<1x32xf32>
    %cst_16 = arith.constant 1.600000e+01 : f32
    %19 = vector.broadcast %cst_16 : f32 to vector<1x32xf32>
    %20 = arith.divf %18, %19 : vector<1x32xf32>
    %21 = arith.mulf %16, %16 : vector<16x32xf32>
    %cst_17 = arith.constant dense<0.000000e+00> : vector<32xf32>
    %22 = vector.multi_reduction <add>, %21, %cst_17 [0] : vector<16x32xf32> to vector<32xf32>
    %23 = vector.shape_cast %22 : vector<32xf32> to vector<1x32xf32>
    %cst_18 = arith.constant 1.600000e+01 : f32
    %24 = vector.broadcast %cst_18 : f32 to vector<1x32xf32>
    %25 = arith.divf %23, %24 : vector<1x32xf32>
    %26 = arith.mulf %20, %20 : vector<1x32xf32>
    %27 = arith.subf %25, %26 : vector<1x32xf32>
    %28 = vector.broadcast %20 : vector<1x32xf32> to vector<16x32xf32>
    %29 = arith.subf %16, %28 : vector<16x32xf32>
    %cst_19 = arith.constant 9.99999974E-6 : f32
    %30 = vector.broadcast %cst_19 : f32 to vector<1x32xf32>
    %31 = arith.addf %27, %30 : vector<1x32xf32>
    %32 = math.rsqrt %31 : vector<1x32xf32>
    %33 = vector.broadcast %32 : vector<1x32xf32> to vector<16x32xf32>
    %34 = arith.mulf %29, %33 : vector<16x32xf32>
    %35 = vector.broadcast %4 : vector<1x32xf32> to vector<16x32xf32>
    %36 = arith.mulf %34, %35 : vector<16x32xf32>
    %37 = vector.broadcast %5 : vector<1x32xf32> to vector<16x32xf32>
    %38 = arith.addf %36, %37 : vector<16x32xf32>
    %cst_20 = arith.constant 0.000000e+00 : f32
    %39 = vector.broadcast %cst_20 : f32 to vector<16x32xf32>
    %40 = arith.maximumf %38, %39 : vector<16x32xf32>
    %cst_21 = arith.constant dense<0.000000e+00> : vector<16x32xf32>
    %41 = tpu.matmul %0, %40, %cst_21 {dimension_numbers = #tpu.dot_dimension_numbers<[1], [0], [0], [1], [0, 0, 1, 1], [], []>} : vector<16x16xf32>, vector<16x32xf32>, vector<16x32xf32> -> vector<16x32xf32>
    %cst_22 = arith.constant dense<0.000000e+00> : vector<16x64xf32>
    %42 = tpu.matmul %41, %11, %cst_22 {dimension_numbers = #tpu.dot_dimension_numbers<[1], [0], [0], [1], [0, 0, 1, 1], [], []>} : vector<16x32xf32>, vector<32x64xf32>, vector<16x64xf32> -> vector<16x64xf32>
    %43 = vector.broadcast %6 : vector<1x64xf32> to vector<16x64xf32>
    %44 = arith.addf %42, %43 : vector<16x64xf32>
    %cst_23 = arith.constant dense<0.000000e+00> : vector<64xf32>
    %45 = vector.multi_reduction <add>, %44, %cst_23 [0] : vector<16x64xf32> to vector<64xf32>
    %46 = vector.shape_cast %45 : vector<64xf32> to vector<1x64xf32>
    %cst_24 = arith.constant 1.600000e+01 : f32
    %47 = vector.broadcast %cst_24 : f32 to vector<1x64xf32>
    %48 = arith.divf %46, %47 : vector<1x64xf32>
    %49 = arith.mulf %44, %44 : vector<16x64xf32>
    %cst_25 = arith.constant dense<0.000000e+00> : vector<64xf32>
    %50 = vector.multi_reduction <add>, %49, %cst_25 [0] : vector<16x64xf32> to vector<64xf32>
    %51 = vector.shape_cast %50 : vector<64xf32> to vector<1x64xf32>
    %cst_26 = arith.constant 1.600000e+01 : f32
    %52 = vector.broadcast %cst_26 : f32 to vector<1x64xf32>
    %53 = arith.divf %51, %52 : vector<1x64xf32>
    %54 = arith.mulf %48, %48 : vector<1x64xf32>
    %55 = arith.subf %53, %54 : vector<1x64xf32>
    %56 = vector.broadcast %48 : vector<1x64xf32> to vector<16x64xf32>
    %57 = arith.subf %44, %56 : vector<16x64xf32>
    %cst_27 = arith.constant 9.99999974E-6 : f32
    %58 = vector.broadcast %cst_27 : f32 to vector<1x64xf32>
    %59 = arith.addf %55, %58 : vector<1x64xf32>
    %60 = math.rsqrt %59 : vector<1x64xf32>
    %61 = vector.broadcast %60 : vector<1x64xf32> to vector<16x64xf32>
    %62 = arith.mulf %57, %61 : vector<16x64xf32>
    %63 = vector.broadcast %7 : vector<1x64xf32> to vector<16x64xf32>
    %64 = arith.mulf %62, %63 : vector<16x64xf32>
    %65 = vector.broadcast %8 : vector<1x64xf32> to vector<16x64xf32>
    %66 = arith.addf %64, %65 : vector<16x64xf32>
    %cst_28 = arith.constant 0.000000e+00 : f32
    %67 = vector.broadcast %cst_28 : f32 to vector<16x64xf32>
    %68 = arith.maximumf %66, %67 : vector<16x64xf32>
    %69 = vector.shape_cast %2 : vector<16x2xf32> to vector<16x2x1xf32>
    %70 = vector.shape_cast %68 : vector<16x64xf32> to vector<16x1x64xf32>
    %71 = vector.broadcast %69 : vector<16x2x1xf32> to vector<16x2x64xf32>
    %72 = vector.broadcast %70 : vector<16x1x64xf32> to vector<16x2x64xf32>
    %73 = arith.mulf %71, %72 : vector<16x2x64xf32>
    %cst_29 = arith.constant dense<0xFF800000> : vector<2x64xf32>
    %74 = vector.multi_reduction <maximumf>, %73, %cst_29 [0] : vector<16x2x64xf32> to vector<2x64xf32>
    %cst_30 = arith.constant dense<0.000000e+00> : vector<2x2xf32>
    %75 = tpu.matmul %74, %12, %cst_30 {dimension_numbers = #tpu.dot_dimension_numbers<[1], [0], [0], [1], [0, 0, 1, 1], [], []>} : vector<2x64xf32>, vector<64x2xf32>, vector<2x2xf32> -> vector<2x2xf32>
    %76 = vector.broadcast %9 : vector<1x2xf32> to vector<2x2xf32>
    %77 = arith.addf %75, %76 : vector<2x2xf32>
    %c0_31 = arith.constant 0 : index
    %c0_32 = arith.constant 0 : index
    %78 = vector.load %arg2[%c0_31, %c0_32] : memref<2x2xf32, #tpu.memory_space<vmem>>, vector<2x2xf32>
    tpu.vector_store %arg2[%c0_31, %c0_32], %77 {strides = array<i32>} : memref<2x2xf32, #tpu.memory_space<vmem>>, vector<2x2xf32>,
    return
  }
}

</mosaic_0001>

<bundles_post_ra>
// kernel: tpu_custom_call.1
= control target key start
LH: loop header
LB: loop body
LE: loop exit
PB: predicated region body
PF: predicated region fallthrough
CT: control target
= control target key end

     0   :  { %7 = vsyncpa [#allocation3], 0  ;;  %s1273_s0 = inlined_call_operand.hbm [shape: f32[16,384], index: 0, kind: input, shape index: {}]   ;;  %s1274_s1 = inlined_call_operand.hbm [shape: f32[112,128], index: 1, kind: input, shape index: {}]   ;;  %s1275_s2 = inlined_call_operand.hbm [shape: f32[2,2], index: 2, kind: output, shape index: {}]  }
   0x1   :  { %8 = vsyncpa [#allocation6], 0 }
   0x2   :  { %9 = vsyncpa [#allocation4], 0  ;;  %s1131_s9 = smov [#allocation2]   ;;  %s1059_s13 = scalar_lea.hbm %s1273_s0, 768 }
   0x3   :  { %s15_s10 = sshll.u32 %s1131_s9, 4  ;;  %p1060_p0 = scmp.ne.s32.totalorder %s1273_s0, %s1059_s13  ;;  %s16_s10 = int_to_ptr.vmem [resolvable:$true] %s15_s10 }
   0x4   :  { %p1063_p1 = scmp.lt.u32.totalorder %s1059_s13, %s1273_s0 }
   0x6   :  { %p1065_p2 = pnand %p1063_p1, %p1060_p0 }
   0x8   :  { %1068 = shalt.err (!%p1065_p2)
}
   0x9   :  { %s1069_s18 = scalar_lea.vmem %s16_s10, 768  ;;  %p1074_p4 = scmp.lt.s32.totalorder %s16_s10, %s16_s10 }
   0xa   :  { %p1070_p3 = scmp.ne.s32.totalorder %s16_s10, %s1069_s18  ;;  %p1075_p5 = scmp.lt.s32.totalorder %s1069_s18, %s1069_s18 }
   0xc   :  { %p1076_p6 = por %p1075_p5, %p1074_p4 }
   0xe   :  { %p1077_p7 = pnand %p1076_p6, %p1070_p3 }
  0x10   :  { %1080 = shalt.err (!%p1077_p7)
}
  0x11   :  { %s1132_s19 = smov 384   ;;  %s1133_s20 = smov 24  }
  0x12   :  { %21 = dma.hbm_to_vmem [thread:$0]  %s1273_s0, 768, %s16_s10, [#allocation3], %s1132_s19, %s1132_s19, %s1133_s20  }
  0x13   :  { %s1134_s23 = smov [#allocation5]   ;;  %s1081_s27 = scalar_lea.hbm %s1274_s1, 1792 }
  0x14   :  { %s27_s24 = sshll.u32 %s1134_s23, 4  ;;  %p1082_p8 = scmp.ne.s32.totalorder %s1274_s1, %s1081_s27  ;;  %s28_s24 = int_to_ptr.vmem [resolvable:$true] %s27_s24 }
  0x15   :  { %p1085_p9 = scmp.lt.u32.totalorder %s1081_s27, %s1274_s1 }
  0x17   :  { %p1087_p10 = pnand %p1085_p9, %p1082_p8 }
  0x19   :  { %1090 = shalt.err (!%p1087_p10)
}
  0x1a   :  { %s1091_s4 = scalar_lea.vmem %s28_s24, 1792  ;;  %p1096_p12 = scmp.lt.s32.totalorder %s28_s24, %s28_s24 }
  0x1b   :  { %p1092_p11 = scmp.ne.s32.totalorder %s28_s24, %s1091_s4  ;;  %p1097_p13 = scmp.lt.s32.totalorder %s1091_s4, %s1091_s4 }
  0x1d   :  { %p1098_p0 = por %p1097_p13, %p1096_p12 }
  0x1f   :  { %p1099_p1 = pnand %p1098_p0, %p1092_p11 }
  0x21   :  { %1102 = shalt.err (!%p1099_p1)
}
  0x22   :  { %s1135_s0 = smov 128   ;;  %s1136_s5 = smov 8  }
  0x23   :  { %33 = dma.hbm_to_vmem [thread:$0]  %s1274_s1, 1792, %s28_s24, [#allocation6], %s1135_s0, %s1135_s0, %s1136_s5  }
  0x24   :  { %1125 = dma.done.wait [#allocation3], 768  }
  0x25   :  { %1126 = vsyncadd [#allocation3], 4294966528 }
  0x26   :  { %1127 = dma.done.wait [#allocation6], 1792  }
  0x27   :  { %1128 = vsyncadd [#allocation6], 4294965504  ;;  %vm66_vm0 = vcmask 130048   ;;  %v42_v0 = vld [vmem:[#allocation2 + $0x8] sm:$0xff]  ;;  %v43_v1 = vld [vmem:[#allocation2 + $0x20] sm:$0xff]  ;;  %vm159_vm1 = vcmask 1042432   ;;  %v489_v58 = vlaneseq }
  0x28   :  { %v40_v2 = vld [vmem:[#allocation2] sm:$0xff]  ;;  %v1016_v3 = vpack.c.bf16 %v43_v1, %v42_v0  ;;  %v1182_v4 = vld [vmem:[#allocation2 + $0x18] sm:$0xff]  ;;  %vm152_vm2 = vcmask 23552   ;;  %v926_v8 = vld [vmem:[#allocation5] ss:$0 sm:$0xff]  ;;  %vm238_vm3 = vcmask 261120  }
  0x29   :  { %971 = vmatprep.mubr.msk.f32.mxu0 %vm66_vm0, %v40_v2  ;;  %v53_v5 = vld [vmem:[#allocation5 + $0x8] sm:$0x7]  ;;  %v930_v41 = vld [vmem:[#allocation5 + $0x1] ss:$0 sm:$0xff]  ;;  %v931_v44 = vld [vmem:[#allocation5 + $0x2] ss:$0 sm:$0xff] }
  0x2a   :  { %1017 = vmatprep.subr.bf16.mxu0 %v1016_v3  ;;  %974 = vmatprep.subr.msk.mxu1 %vm159_vm1, %v53_v5  ;;  %v54_v49 = vld [vmem:[#allocation5 + $0x10] sm:$0xff]  ;;  %v55_v50 = vld [vmem:[#allocation5 + $0x18] sm:$0xff]  ;;  %v56_v55 = vld [vmem:[#allocation5 + $0x20] sm:$0xff]  ;;  %v1193_v59 = vshrl.u32 %v489_v58, 7  ;;  %vm1138_vm4 = vmmov 0   ;;  %vm444_vm5 = vcmask 523264  }
  0x2b   :  { %1019 = vmatpush3.bf16.msra.mxu0 %v1016_v3  ;;  %975 = vmatpush3.msk.msra.mxu1 %vm159_vm1, %v53_v5  ;;  %v1024_v54 = vpack.c.bf16 %v55_v50, %v54_v49  ;;  %v57_v56 = vld [vmem:[#allocation5 + $0x28] sm:$0xff]  ;;  %v44_v60 = vld [vmem:[#allocation2 + $0x10] sm:$0xff]  ;;  %vm797_vm6 = vcmask 517120   ;;  %s1141_s1 = smov [#allocation7]   ;;  %vm906_vm7 = vcmask 9216  }
  0x2c   :  { %v1028_v57 = vpack.c.bf16 %v57_v56, %v56_v55  ;;  %v1196_v61 = vsub.s32 0, %v1193_v59  ;;  %v505_v62 = vsub.s32 2, %v1193_v59  ;;  %v498_v63 = vsub.s32 1, %v1193_v59  ;;  %s914_s8 = sshll.u32 %s1141_s1, 4  ;;  %s915_s8 = int_to_ptr.vmem [resolvable:$true] %s914_s8 }
  0x2d   :  { %v512_v0 = vsub.s32 3, %v1193_v59  ;;  %v519_v5 = vsub.s32 4, %v1193_v59  ;;  %s1103_s9 = scalar_lea.vmem %s915_s8, 32  ;;  %p1108_p3 = scmp.lt.s32.totalorder %s915_s8, %s915_s8 }
  0x2e   :  { %972 = vmatmul.mubr.msk.f32.vlgmr.msra.gmra.mrb[0].mxu0 %vm66_vm0, %v1182_v4  ;;  %v492_v1 = vrot.slane %v44_v60, %v1196_v61  ;;  %v499_v3 = vrot.slane %v44_v60, %v498_v63  ;;  %p1104_p2 = scmp.ne.s32.totalorder %s915_s8, %s1103_s9  ;;  %p1109_p4 = scmp.lt.s32.totalorder %s1103_s9, %s1103_s9 }
  0x2f   :  { %983 = vmatprep.mubr.msk.f32.mxu0 %vm66_vm0, %v40_v2  ;;  %v506_v2 = vrot.slane %v44_v60, %v505_v62 }
  0x30   :  { %494 = vbcast.lane.b32.xlu0 %v492_v1, 256  ;;  %p1110_p5 = por %p1109_p4, %p1108_p3 }
  0x31   :  { %508 = vbcast.lane.b32.xlu1 %v506_v2, 256 }
  0x32   :  { %p1111_p6 = pnand %p1110_p5, %p1104_p2 }
  0x34   :  { %501 = vbcast.lane.b32.xlu0 %v499_v3, 256 }
 0x101   :  { %v973_v6 = vpop.f32.mrb[0].mxu0 }
 0x102   :  { %v139_v7 = vpop.f32.mrb[1].mxu0 }
 0x103   :  { %976 = vmatprep.mubr.msk.f32.mxu1 %vm152_vm2, %v139_v7  ;;  %v520_v7 = vrot.slane %v44_v60, %v519_v5 }
 0x104   :  { %977 = vmatmul.mubr.msk.f32.vlgmr.msra.gmra.mrb[0].mxu1 %vm152_vm2, %v973_v6  ;;  %v526_v6 = vsub.s32 5, %v1193_v59 }
 0x105   :  { %522 = vbcast.lane.b32.xlu0 %v520_v7, 256  ;;  %v495_v7 = vpop.permute.xlu0 %494 }
 0x1d7   :  { %v978_v9 = vpop.f32.mrb[0].mxu1 }
 0x1d8   :  { %v235_v10 = vadd.f32 %v978_v9, %v926_v8  ;;  %v229_v11 = vpop.f32.mrb[1].mxu1  ;;  %v533_v9 = vsub.s32 6, %v1193_v59 }
 0x1d9   :  { %v230_v12 = vadd.f32 %v926_v8, %v229_v11  ;;  %v527_v8 = vrot.slane %v44_v60, %v526_v6 }
 0x1da   :  { %v240_v13 = vsel %vm238_vm3, %v235_v10, 0.0  ;;  %v251_v14 = vmul.f32 %v235_v10, %v235_v10  ;;  %v534_v11 = vrot.slane %v44_v60, %v533_v9 }
 0x1db   :  { %v239_v15 = vsel %vm238_vm3, %v230_v12, 0.0  ;;  %v250_v16 = vmul.f32 %v230_v12, %v230_v12 }
 0x1dc   :  { %v253_v17 = vsel %vm238_vm3, %v251_v14, 0.0  ;;  %v241_v18 = vadd.f32 %v240_v13, %v239_v15  ;;  %v45_v13 = vld [vmem:[#allocation2 + $0x28] sm:$0xff]  ;;  %536 = vbcast.lane.b32.xlu0 %v534_v11, 256 }
 0x1dd   :  { %v252_v19 = vsel %vm238_vm3, %v250_v16, 0.0  ;;  %v548_v14 = vrot.slane %v45_v13, %v1196_v61  ;;  %v555_v15 = vrot.slane %v45_v13, %v498_v63  ;;  %v562_v16 = vrot.slane %v45_v13, %v505_v62 }
 0x1de   :  { %v242_v20 = vrot.slane %v241_v18, 4  ;;  %v254_v21 = vadd.f32 %v253_v17, %v252_v19  ;;  %v569_v17 = vrot.slane %v45_v13, %v512_v0  ;;  %v583_v19 = vrot.slane %v45_v13, %v526_v6 }
 0x1e0   :  { %v243_v22 = vadd.f32 %v242_v20, %v241_v18  ;;  %v255_v23 = vrot.slane %v254_v21, 4  ;;  %550 = vbcast.lane.b32.xlu0 %v548_v14, 256  ;;  %v576_v18 = vrot.slane %v45_v13, %v519_v5  ;;  %v590_v20 = vrot.slane %v45_v13, %v533_v9  ;;  %v509_v9 = vpop.permute.xlu1 %508 }
 0x1e2   :  { %v244_v24 = vrot.slane %v243_v22, 2  ;;  %v256_v25 = vadd.f32 %v255_v23, %v254_v21 }
 0x1e4   :  { %v245_v26 = vadd.f32 %v244_v24, %v243_v22  ;;  %v257_v27 = vrot.slane %v256_v25, 2  ;;  %564 = vbcast.lane.b32.xlu0 %v562_v16, 256  ;;  %v58_v24 = vld [vmem:[#allocation5 + $0x30] sm:$0xff]  ;;  %v937_v16 = vld [vmem:[#allocation5 + $0x4] ss:$0 sm:$0xff] }
 0x1e6   :  { %v246_v28 = vrot.slane %v245_v26, 1  ;;  %v258_v29 = vadd.f32 %v257_v27, %v256_v25  ;;  %v59_v25 = vld [vmem:[#allocation5 + $0x38] sm:$0xff]  ;;  %v1137_v27 = vmov 0.0|0.0  }
 0x1e7   :  { %1032 = vmatprep.subr.bf16.mxu1 %v1137_v27 }
 0x1e8   :  { %v247_v30 = vadd.f32 %v246_v28, %v245_v26  ;;  %v259_v31 = vrot.slane %v258_v29, 1  ;;  %578 = vbcast.lane.b32.xlu0 %v576_v18, 256  ;;  %v1033_v26 = vpack.c.bf16 %v59_v25, %v58_v24  ;;  %v60_v28 = vld [vmem:[#allocation5 + $0x40] sm:$0xff] }
 0x1ea   :  { %v249_v32 = vmul.f32 0.0625, %v247_v30  ;;  %v260_v33 = vadd.f32 %v259_v31, %v258_v29  ;;  %1034 = vmatpush3.bf16.msra.mxu1 %v1033_v26  ;;  %v61_v29 = vld [vmem:[#allocation5 + $0x48] sm:$0xff]  ;;  %v62_v31 = vld [vmem:[#allocation5 + $0x50] sm:$0xff] }
 0x1eb   :  { %1035 = vmatprep.subr.bf16.mxu1 %v1137_v27  ;;  %v1036_v30 = vpack.c.bf16 %v61_v29, %v60_v28 }
 0x1ec   :  { %v261_v34 = vmul.f32 0.0625, %v260_v33  ;;  %v262_v35 = vmul.f32 %v249_v32, %v249_v32  ;;  %v264_v36 = vsub.f32 %v230_v12, %v249_v32  ;;  %v265_v37 = vsub.f32 %v235_v10, %v249_v32  ;;  %592 = vbcast.lane.b32.xlu0 %v590_v20, 256  ;;  %v63_v32 = vld [vmem:[#allocation5 + $0x58] sm:$0xff] }
 0x1ed   :  { %v540_v10 = vsub.s32 7, %v1193_v59  ;;  %v1039_v33 = vpack.c.bf16 %v63_v32, %v62_v31 }
 0x1ee   :  { %v263_v38 = vsub.f32 %v261_v34, %v262_v35  ;;  %1037 = vmatpush3.bf16.msra.mxu1 %v1036_v30  ;;  %v64_v34 = vld [vmem:[#allocation5 + $0x60] sm:$0xff]  ;;  %v65_v35 = vld [vmem:[#allocation5 + $0x68] sm:$0xff] }
 0x1ef   :  { %v541_v12 = vrot.slane %v44_v60, %v540_v10  ;;  %v597_v21 = vrot.slane %v45_v13, %v540_v10  ;;  %1038 = vmatprep.subr.bf16.mxu1 %v1137_v27  ;;  %v502_v10 = vpop.permute.xlu0 %501 }
 0x1f0   :  { %v266_v39 = vadd.f32 1e-05, %v263_v38  ;;  %v934_v38 = vld [vmem:[#allocation5 + $0x3] ss:$0 sm:$0xff] }
 0x1f2   :  { %1055 = vrsqrt.f32 %v266_v39  ;;  %1040 = vmatpush3.bf16.msra.mxu1 %v1039_v33 }
 0x1f3   :  { %1041 = vmatprep.subr.bf16.mxu1 %v1137_v27  ;;  %v523_v14 = vpop.permute.xlu0 %522 }
 0x1fc   :  { %v1056_v40 = vpop.eup %1055 }
 0x1fd   :  { %v268_v42 = vmul.f32 %v1056_v40, %v264_v36  ;;  %v269_v43 = vmul.f32 %v1056_v40, %v265_v37  ;;  %v1042_v36 = vpack.c.bf16 %v65_v35, %v64_v34  ;;  %v1139_v37 = vmov 0.0  }
 0x1fe   :  { %1013 = vmatprep.mubr.msk.f32.mxu1 %vm1138_vm4, %v1139_v37 }
 0x1ff   :  { %v274_v45 = vmul.f32 %v930_v41, %v268_v42  ;;  %v275_v46 = vmul.f32 %v930_v41, %v269_v43  ;;  %1043 = vmatpush3.bf16.msra.mxu1 %v1042_v36 }
 0x201   :  { %v280_v47 = vadd.f32 %v931_v44, %v274_v45  ;;  %v281_v48 = vadd.f32 %v931_v44, %v275_v46 }
 0x203   :  { %v282_v51 = vmax.f32 %v280_v47, 0.0  ;;  %v283_v52 = vmax.f32 %v281_v48, 0.0 }
 0x205   :  { %v1020_v53 = vpack.c.bf16 %v283_v52, %v282_v51 }
 0x207   :  { %1021 = vmatprep.subr.bf16.mxu0 %v1020_v53 }
 0x208   :  { %1023 = vmatpush3.bf16.msra.mxu0 %v1020_v53 }
 0x209   :  { %1025 = vmatprep.subr.bf16.mxu0 %v1024_v54 }
 0x20b   :  { %984 = vmatmul.mubr.msk.f32.vlgmr.msra.gmra.mrb[2].mxu0 %vm66_vm0, %v1182_v4  ;;  %v513_v4 = vrot.slane %v44_v60, %v512_v0 }
 0x20c   :  { %1027 = vmatpush3.bf16.msra.mxu0 %v1024_v54 }
 0x20d   :  { %1029 = vmatprep.subr.bf16.mxu0 %v1028_v57  ;;  %515 = vbcast.lane.b32.xlu1 %v513_v4, 256 }
 0x210   :  { %1031 = vmatpush3.bf16.msra.mxu0 %v1028_v57 }
 0x211   :  { %529 = vbcast.lane.b32.xlu1 %v527_v8, 256 }
 0x215   :  { %543 = vbcast.lane.b32.xlu1 %v541_v12, 256  ;;  %v1140_v12 = vmov 1966171168  }
 0x216   :  { %v605_v13 = vunpack.c.l.s4 %v1140_v12 }
 0x219   :  { %557 = vbcast.lane.b32.xlu1 %v555_v15, 256 }
 0x21d   :  { %571 = vbcast.lane.b32.xlu1 %v569_v17, 256 }
 0x221   :  { %585 = vbcast.lane.b32.xlu1 %v583_v19, 256  ;;  %v606_v19 = vunpack.c.0.s8 %v605_v13 }
 0x223   :  { %v1214_v25 = vsub.s32 %v606_v19, %v1193_v59 }
 0x225   :  { %599 = vbcast.lane.b32.xlu1 %v597_v21, 256  ;;  %v938_v21 = vld [vmem:[#allocation5 + $0x5] ss:$0 sm:$0xff] }
 0x24e   :  { %v537_v24 = vpop.permute.xlu0 %536 }
 0x252   :  { %v551_v35 = vpop.permute.xlu0 %550 }
 0x27f   :  { %v516_v11 = vpop.permute.xlu1 %515 }
 0x283   :  { %v530_v17 = vpop.permute.xlu1 %529 }
 0x287   :  { %v544_v28 = vpop.permute.xlu1 %543 }
 0x2de   :  { %v985_v22 = vpop.f32.mrb[2].mxu0 }
 0x2df   :  { %v350_v23 = vpop.f32.mrb[3].mxu0 }
 0x2e0   :  { %994 = vmatprep.mubr.msk.f32.mxu0 %vm238_vm3, %v350_v23 }
 0x2e1   :  { %995 = vmatmul.mubr.msk.f32.vlgmr.msra.gmra.mrb[4].mxu0 %vm238_vm3, %v985_v22 }
 0x3b4   :  { %v996_v39 = vpop.f32.mrb[4].mxu0 }
 0x3b5   :  { %v441_v40 = vadd.f32 %v996_v39, %v934_v38  ;;  %v435_v41 = vpop.f32.mrb[5].mxu0  ;;  %v558_v39 = vpop.permute.xlu1 %557 }
 0x3b6   :  { %v436_v42 = vadd.f32 %v934_v38, %v435_v41 }
 0x3b7   :  { %v446_v43 = vsel %vm444_vm5, %v441_v40, 0.0  ;;  %v456_v44 = vmul.f32 %v441_v40, %v441_v40 }
 0x3b8   :  { %v445_v45 = vsel %vm444_vm5, %v436_v42, 0.0  ;;  %v455_v46 = vmul.f32 %v436_v42, %v436_v42 }
 0x3b9   :  { %v458_v47 = vsel %vm444_vm5, %v456_v44, 0.0  ;;  %v447_v48 = vadd.f32 %v446_v43, %v445_v45 }
 0x3ba   :  { %v457_v49 = vsel %vm444_vm5, %v455_v46, 0.0 }
 0x3bb   :  { %v448_v50 = vrot.slane %v447_v48, 4  ;;  %v459_v51 = vadd.f32 %v458_v47, %v457_v49 }
 0x3bd   :  { %v449_v52 = vadd.f32 %v448_v50, %v447_v48  ;;  %v460_v53 = vrot.slane %v459_v51, 4 }
 0x3bf   :  { %v450_v54 = vrot.slane %v449_v52, 2  ;;  %v461_v55 = vadd.f32 %v460_v53, %v459_v51 }
 0x3c1   :  { %v451_v56 = vadd.f32 %v450_v54, %v449_v52  ;;  %v462_v57 = vrot.slane %v461_v55, 2 }
 0x3c3   :  { %v452_v58 = vrot.slane %v451_v56, 1  ;;  %v463_v60 = vadd.f32 %v462_v57, %v461_v55 }
 0x3c5   :  { %v453_v62 = vadd.f32 %v452_v58, %v451_v56  ;;  %v464_v63 = vrot.slane %v463_v60, 1  ;;  %v565_v58 = vpop.permute.xlu0 %564 }
 0x3c7   :  { %v454_v0 = vmul.f32 0.0625, %v453_v62  ;;  %v465_v1 = vadd.f32 %v464_v63, %v463_v60 }
 0x3c9   :  { %v466_v2 = vmul.f32 0.0625, %v465_v1  ;;  %v467_v3 = vmul.f32 %v454_v0, %v454_v0  ;;  %v469_v4 = vsub.f32 %v436_v42, %v454_v0  ;;  %v470_v5 = vsub.f32 %v441_v40, %v454_v0 }
 0x3cb   :  { %v468_v6 = vsub.f32 %v466_v2, %v467_v3 }
 0x3cd   :  { %v471_v8 = vadd.f32 1e-05, %v468_v6 }
 0x3cf   :  { %1057 = vrsqrt.f32 %v471_v8 }
 0x3d9   :  { %v1058_v15 = vpop.eup %1057 }
 0x3da   :  { %v473_v18 = vmul.f32 %v1058_v15, %v469_v4  ;;  %v474_v20 = vmul.f32 %v1058_v15, %v470_v5  ;;  %v572_v5 = vpop.permute.xlu1 %571 }
 0x3dc   :  { %v479_v22 = vmul.f32 %v937_v16, %v473_v18  ;;  %v480_v23 = vmul.f32 %v937_v16, %v474_v20 }
 0x3de   :  { %v485_v26 = vadd.f32 %v938_v21, %v479_v22  ;;  %v486_v27 = vadd.f32 %v938_v21, %v480_v23  ;;  %v579_v23 = vpop.permute.xlu0 %578 }
 0x3e0   :  { %v487_v29 = vmax.f32 %v485_v26, 0.0  ;;  %v488_v30 = vmax.f32 %v486_v27, 0.0 }
 0x3e2   :  { %v610_v31 = vrot.slane %v487_v29, %v1214_v25  ;;  %v603_v32 = vcombine.high %v487_v29, %v487_v29  ;;  %v659_v33 = vrot.slane %v488_v30, %v1214_v25  ;;  %v652_v34 = vcombine.high %v488_v30, %v488_v30 }
 0x3e4   :  { %v626_v36 = vrot.slane %v610_v31, %v1214_v25  ;;  %v618_v37 = vcombine.high %v610_v31, %v610_v31  ;;  %v617_v38 = vrot.slane %v603_v32, %v1214_v25  ;;  %v675_v59 = vrot.slane %v659_v33, %v1214_v25 }
 0x3e5   :  { %v667_v40 = vcombine.high %v659_v33, %v659_v33  ;;  %v666_v41 = vrot.slane %v652_v34, %v1214_v25  ;;  %v586_v33 = vpop.permute.xlu1 %585 }
 0x3e6   :  { %v704_v42 = vrot.slane %v626_v36, %v1196_v61  ;;  %v648_v43 = vcombine.high %v626_v36, %v626_v36  ;;  %v640_v44 = vrot.slane %v618_v37, %v1214_v25  ;;  %v633_v45 = vrot.slane %v617_v38, %v1214_v25 }
 0x3e7   :  { %v619_v46 = vcombine.high %v617_v38, %v617_v38  ;;  %v736_v47 = vrot.slane %v675_v59, %v1196_v61  ;;  %v689_v48 = vrot.slane %v667_v40, %v1214_v25  ;;  %v697_v49 = vcombine.high %v675_v59, %v675_v59 }
 0x3e8   :  { %v781_v50 = vmul.f32 %v704_v42, %v495_v7  ;;  %v712_v51 = vrot.slane %v648_v43, %v1196_v61  ;;  %v708_v52 = vrot.slane %v640_v44, %v1196_v61  ;;  %v650_v53 = vcombine.high %v640_v44, %v640_v44 }
 0x3e9   :  { %v720_v54 = vrot.slane %v633_v45, %v1196_v61  ;;  %v647_v55 = vrot.slane %v619_v46, %v1214_v25  ;;  %v649_v56 = vcombine.high %v633_v45, %v633_v45  ;;  %v789_v57 = vmul.f32 %v736_v47, %v551_v35  ;;  %v593_v45 = vpop.permute.xlu0 %592 }
 0x3ea   :  { %v798_v60 = vsel %vm797_vm6, %v781_v50, -inf  ;;  %v783_v62 = vmul.f32 %v712_v51, %v509_v9  ;;  %v782_v63 = vmul.f32 %v708_v52, %v502_v10  ;;  %v716_v0 = vrot.slane %v650_v53, %v1196_v61  ;;  %v600_v50 = vpop.permute.xlu1 %599 }
 0x3eb   :  { %v785_v1 = vmul.f32 %v720_v54, %v523_v14  ;;  %v724_v2 = vrot.slane %v647_v55, %v1196_v61  ;;  %v728_v3 = vrot.slane %v649_v56, %v1196_v61  ;;  %v651_v4 = vcombine.high %v647_v55, %v647_v55 }
 0x3ec   :  { %v800_v6 = vsel %vm797_vm6, %v783_v62, -inf  ;;  %v799_v7 = vsel %vm797_vm6, %v782_v63, -inf  ;;  %v784_v8 = vmul.f32 %v716_v0, %v516_v11  ;;  %v810_v12 = vsel %vm797_vm6, %v789_v57, -inf }
 0x3ed   :  { %v802_v13 = vsel %vm797_vm6, %v785_v1, -inf  ;;  %v786_v9 = vmul.f32 %v724_v2, %v530_v17  ;;  %v787_v10 = vmul.f32 %v728_v3, %v537_v24  ;;  %v732_v15 = vrot.slane %v651_v4, %v1196_v61  ;;  %v939_v2 = vld [vmem:[#allocation5 + $0x6] ss:$0 sm:$0xff] }
 0x3ee   :  { %v801_v14 = vsel %vm797_vm6, %v784_v8, -inf  ;;  %v803_v16 = vmax.f32 %v798_v60, %v802_v13  ;;  %v740_v18 = vrot.slane %v689_v48, %v1196_v61  ;;  %v744_v19 = vrot.slane %v697_v49, %v1196_v61 }
 0x3ef   :  { %v804_v20 = vsel %vm797_vm6, %v786_v9, -inf  ;;  %v806_v21 = vsel %vm797_vm6, %v787_v10, -inf  ;;  %v788_v11 = vmul.f32 %v732_v15, %v544_v28  ;;  %v699_v22 = vcombine.high %v689_v48, %v689_v48 }
 0x3f0   :  { %v805_v26 = vmax.f32 %v799_v7, %v804_v20  ;;  %v807_v27 = vmax.f32 %v800_v6, %v806_v21  ;;  %v811_v17 = vmax.f32 %v803_v16, %v810_v12  ;;  %v790_v24 = vmul.f32 %v740_v18, %v558_v39 }
 0x3f1   :  { %v808_v29 = vsel %vm797_vm6, %v788_v11, -inf  ;;  %v791_v30 = vmul.f32 %v744_v19, %v565_v58  ;;  %v748_v31 = vrot.slane %v699_v22, %v1196_v61  ;;  %v682_v32 = vrot.slane %v666_v41, %v1214_v25 }
 0x3f2   :  { %v809_v34 = vmax.f32 %v801_v14, %v808_v29  ;;  %v812_v35 = vsel %vm797_vm6, %v790_v24, -inf  ;;  %v668_v36 = vcombine.high %v666_v41, %v666_v41 }
 0x3f3   :  { %v813_v37 = vmax.f32 %v805_v26, %v812_v35  ;;  %v814_v28 = vsel %vm797_vm6, %v791_v30, -inf  ;;  %v792_v38 = vmul.f32 %v748_v31, %v572_v5  ;;  %v752_v59 = vrot.slane %v682_v32, %v1196_v61 }
 0x3f4   :  { %v815_v40 = vmax.f32 %v807_v27, %v814_v28  ;;  %v696_v39 = vrot.slane %v668_v36, %v1214_v25  ;;  %v698_v42 = vcombine.high %v682_v32, %v682_v32 }
 0x3f5   :  { %v816_v43 = vsel %vm797_vm6, %v792_v38, -inf  ;;  %v793_v44 = vmul.f32 %v752_v59, %v579_v23 }
 0x3f6   :  { %v817_v46 = vmax.f32 %v809_v34, %v816_v43  ;;  %v756_v47 = vrot.slane %v696_v39, %v1196_v61  ;;  %v760_v48 = vrot.slane %v698_v42, %v1196_v61  ;;  %v700_v41 = vcombine.high %v696_v39, %v696_v39 }
 0x3f7   :  { %v818_v49 = vsel %vm797_vm6, %v793_v44, -inf }
 0x3f8   :  { %v819_v51 = vmax.f32 %v811_v17, %v818_v49  ;;  %v794_v52 = vmul.f32 %v756_v47, %v586_v33  ;;  %v795_v53 = vmul.f32 %v760_v48, %v593_v45  ;;  %v764_v54 = vrot.slane %v700_v41, %v1196_v61 }
 0x3fa   :  { %v820_v25 = vsel %vm797_vm6, %v794_v52, -inf  ;;  %v822_v55 = vsel %vm797_vm6, %v795_v53, -inf  ;;  %v796_v56 = vmul.f32 %v764_v54, %v600_v50 }
 0x3fb   :  { %v821_v57 = vmax.f32 %v813_v37, %v820_v25  ;;  %v823_v58 = vmax.f32 %v815_v40, %v822_v55 }
 0x3fc   :  { %v824_v60 = vsel %vm797_vm6, %v796_v56, -inf }
 0x3fd   :  { %v826_v62 = vmax.f32 %v819_v51, %v821_v57  ;;  %v825_v63 = vmax.f32 %v817_v46, %v824_v60 }
 0x3ff   :  { %v827_v0 = vmax.f32 %v823_v58, %v825_v63 }
 0x401   :  { %v828_v1 = vmax.f32 %v826_v62, %v827_v0 }
 0x403   :  { %1014 = vmatmul.mubr.msk.f32.vlgmr.msra.gmra.mrb[2].mxu1 %vm444_vm5, %v828_v1 }
 0x4d6   :  { %v902_v3 = vpop.f32.mrb[2].mxu1 }
 0x4d7   :  { %v903_v61 = vadd.f32 %v939_v2, %v902_v3  ;;  %v1015_v4 = vpop.f32.mrb[3].mxu1 }
 0x4d9   :  { %907 = vst.msk [vmem:[#allocation7] sm:$0x3] %vm906_vm7, %v903_v61 }
 0x4da   :  { %1114 = shalt.err (!%p1111_p6)
}
 0x4db   :  { %s1115_s12 = scalar_lea.hbm %s1275_s2, 32 }
 0x4dc   :  { %p1116_p7 = scmp.ne.s32.totalorder %s1275_s2, %s1115_s12  ;;  %p1119_p8 = scmp.lt.u32.totalorder %s1115_s12, %s1275_s2 }
 0x4de   :  { %p1121_p9 = pnand %p1119_p8, %p1116_p7 }
 0x4e0   :  { %1124 = shalt.err (!%p1121_p9)
}
 0x4e1   :  { %917 = dma.vmem_to_hbm [thread:$0]  %s915_s8, 32, %s1275_s2, [#allocation4]  }
 0x4e2   :  { %1129 = dma.done.wait [#allocation4], 32  }
 0x4e3   :  { %1130 = vsyncadd [#allocation4], 4294967264 }
 0x4e4   :  { %921 = vsyncpa [#allocation3], 1 }
 0x4e5   :  { %922 = vsyncpa [#allocation6], 1 }
 0x4e6   :  { %923 = vsyncpa [#allocation4], 1 }

</bundles_post_ra>
